<compile_context>
chip_gen: v7x
topology: tpu7x:2x2x1
jax: 0.10.0
libtpu: 0.0.40
codegen_flags: <defaults>
</compile_context>

<pallas_src>
import functools

import jax
import jax.numpy as jnp
from jax.experimental import pallas as pl
from jax.experimental.pallas import tpu as pltpu

HIDDEN = 2000        # fixed by the module definition
HIDDEN_PAD = 2048    # zero-padded hidden dim (exact: zero hidden units contribute 0)


def _round_up(v, m):
    return ((v + m - 1) // m) * m


def _vmem_limit_bytes():
    """Generation-aware scoped-VMEM limit: ~48 MiB on v7x, ~96 MiB on v5e/v6e."""
    try:
        info = pltpu.get_tpu_info()
        cap = getattr(info, "vmem_capacity_bytes", None)
        if cap:
            return int(cap) * 3 // 4
    except Exception:
        pass
    return 48 * 1024 * 1024  # conservative fallback (safe on v7x's 64 MiB)


_VMEM_LIMIT = _vmem_limit_bytes()


def _mlp_kernel(x_ref, w1_ref, b1_ref, w2_ref, b2_ref, o_ref):
    # x_ref: (tm, in) f32, w1_ref: (in, 2048) bf16, b1_ref: (1, 2048) bf16,
    # w2_ref: (2048, emb_pad) bf16, b2_ref: (1, emb_pad) f32, o_ref: (tm, emb_pad).
    # Cast the input tile to bf16 on-chip (VPU work hidden under the matmuls).
    x = x_ref[...].astype(jnp.bfloat16)
    # First matmul on the MXU, f32 accumulation.
    h = jnp.dot(x, w1_ref[...], preferred_element_type=jnp.float32)
    # Bias + ReLU in packed bf16: halves the VPU vreg traffic on the hidden slab
    # and feeds the second matmul directly (no separate convert pass).
    h = jnp.maximum(h.astype(jnp.bfloat16) + b1_ref[...], 0)
    # Single K=2048 second matmul; accumulation stays inside the MXU result path.
    acc = jnp.dot(h, w2_ref[...], preferred_element_type=jnp.float32)
    o_ref[...] = (acc + b2_ref[...]).astype(o_ref.dtype)


def prepare_params(w1, b1, w2, b2):
    """One-time parameter prep (call once, outside the per-step forward).

    Accepts PyTorch-style 1-D biases or (1, H) biases.  Returns padded / cast
    parameters plus the true emb_size:
      w1: (in, 2048) bf16, b1: (1, 2048) bf16,
      w2: (2048, emb_pad) bf16, b2: (1, emb_pad) f32.
    """
    in_size, hidden = w1.shape
    emb = w2.shape[-1]
    b1 = jnp.reshape(b1, (1, hidden))
    b2 = jnp.reshape(b2, (1, emb))

    hpad = HIDDEN_PAD - hidden
    if hpad:
        w1 = jnp.pad(w1, ((0, 0), (0, hpad)))
        b1 = jnp.pad(b1, ((0, 0), (0, hpad)))
        w2 = jnp.pad(w2, ((0, hpad), (0, 0)))

    emb_pad = _round_up(emb, 128)   # lane-dense output (unmasked stores)
    epad = emb_pad - emb
    if epad:
        w2 = jnp.pad(w2, ((0, 0), (0, epad)))
        b2 = jnp.pad(b2, ((0, 0), (0, epad)))

    return (w1.astype(jnp.bfloat16), b1.astype(jnp.bfloat16),
            w2.astype(jnp.bfloat16), b2.astype(jnp.float32), emb)


@functools.partial(jax.jit, static_argnames=("emb_size", "tm"))
def token_embedding(x, w1, b1, w2, b2, *, emb_size, tm=512):
    """x: (..., input_size) -> (..., emb_size). w*/b* come from prepare_params."""
    in_size = x.shape[-1]
    lead = x.shape[:-1]
    out_dtype = x.dtype
    emb_pad = w2.shape[-1]

    x2 = x.reshape(-1, in_size)          # stays f32; bf16 cast happens in-kernel
    n = x2.shape[0]

    # Row tile: large for throughput, but keep grid >= 2 steps for 16 <= n <= tm
    # so the "parallel" axis shards across both v7x TensorCores.
    if n >= 16:
        tm_eff = max(8, min(tm, _round_up(pl.cdiv(n, 2), 8)))
    else:
        tm_eff = max(8, _round_up(n, 8))
    grid = (pl.cdiv(n, tm_eff),)

    # TODO(synk): for very large in_size (resident w1 > ~half the v7x VMEM budget),
    # add a K-over-in_size grid axis with an accumulator instead of whole-w1 residency.

    resident = functools.partial(pl.BlockSpec, pipeline_mode=pl.Buffered(1))

    out = pl.pallas_call(
        _mlp_kernel,
        out_shape=jax.ShapeDtypeStruct((n, emb_pad), out_dtype),
        grid_spec=pltpu.PrefetchScalarGridSpec(
            num_scalar_prefetch=0,
            grid=grid,
            in_specs=[
                pl.BlockSpec((tm_eff, in_size), lambda i: (i, 0)),
                # Grid-invariant weights/biases: single-buffered VMEM residency.
                resident((in_size, HIDDEN_PAD), lambda i: (0, 0)),
                resident((1, HIDDEN_PAD), lambda i: (0, 0)),
                resident((HIDDEN_PAD, emb_pad), lambda i: (0, 0)),
                resident((1, emb_pad), lambda i: (0, 0)),
            ],
            out_specs=pl.BlockSpec((tm_eff, emb_pad), lambda i: (i, 0)),
        ),
        compiler_params=pltpu.CompilerParams(
            dimension_semantics=("parallel",),
            vmem_limit_bytes=_VMEM_LIMIT,
        ),
    )(x2, w1, b1, w2, b2)

    return out[:, :emb_size].reshape(*lead, emb_size)


def init_params(key, input_size, emb_size, dtype=jnp.float32):
    """Deterministic synthetic init (PyTorch-Linear-style uniform bounds, 1-D biases)."""
    k1, k2, k3, k4 = jax.random.split(key, 4)
    lim1 = 1.0 / (input_size ** 0.5)
    lim2 = 1.0 / (HIDDEN ** 0.5)
    w1 = jax.random.uniform(k1, (input_size, HIDDEN), dtype, -lim1, lim1)
    b1 = jax.random.uniform(k2, (HIDDEN,), dtype, -lim1, lim1)
    w2 = jax.random.uniform(k3, (HIDDEN, emb_size), dtype, -lim2, lim2)
    b2 = jax.random.uniform(k4, (emb_size,), dtype, -lim2, lim2)
    return w1, b1, w2, b2


if __name__ == "__main__":
    key = jax.random.PRNGKey(0)
    batch, seq, input_size, emb_size = 2, 8, 32, 64

    kx, kp = jax.random.split(key)
    x = jax.random.normal(kx, (batch, seq, input_size), jnp.float32)
    w1, b1, w2, b2 = init_params(kp, input_size, emb_size)

    # One-time parameter prep (pad + cast), outside the jitted forward path.
    pw1, pb1, pw2, pb2, emb = prepare_params(w1, b1, w2, b2)

    out = token_embedding(x, pw1, pb1, pw2, pb2, emb_size=emb)
    out = jax.block_until_ready(out)

    # Reference check in plain f32 JAX (kernel uses bf16 MXU inputs / bf16 bias+ReLU
    # with f32 accumulation, hence the relaxed tolerance).
    ref = jnp.maximum(x.reshape(-1, input_size) @ w1 + b1, 0.0) @ w2 + b2
    ref = ref.reshape(batch, seq, emb_size)
    assert out.shape == (batch, seq, emb_size)
    assert jnp.allclose(out, ref, atol=5e-2, rtol=5e-2), (
        float(jnp.max(jnp.abs(out - ref))))

    print("KERNEL_OK")
</pallas_src>

<mosaic_0001>
module attributes {stable_mosaic.version = 11 : i64} {
  func.func @_mlp_kernel(%arg0: i32, %arg1: memref<8x32xf32, #tpu.memory_space<vmem>>, %arg2: memref<32x2048xbf16, #tpu.memory_space<vmem>>, %arg3: memref<1x2048xbf16, #tpu.memory_space<vmem>>, %arg4: memref<2048x128xbf16, #tpu.memory_space<vmem>>, %arg5: memref<1x128xf32, #tpu.memory_space<vmem>>, %arg6: memref<8x128xf32, #tpu.memory_space<vmem>>) attributes {dimension_semantics = [#tpu.dimension_semantics<parallel>], iteration_bounds = array<i64: 2>, scalar_prefetch = 0 : i64, scratch_operands = 0 : i64, tpu.core_type = #tpu.core_type<tc>, window_params = [{transform_indices = @transform_0, window_bounds = array<i64: 8, 32>}, {pipeline_mode = #tpu.pipeline_mode<synchronous>, transform_indices = @transform_1, window_bounds = array<i64: 32, 2048>}, {pipeline_mode = #tpu.pipeline_mode<synchronous>, transform_indices = @transform_2, window_bounds = array<i64: 1, 2048>}, {pipeline_mode = #tpu.pipeline_mode<synchronous>, transform_indices = @transform_3, window_bounds = array<i64: 2048, 128>}, {pipeline_mode = #tpu.pipeline_mode<synchronous>, transform_indices = @transform_4, window_bounds = array<i64: 1, 128>}, {transform_indices = @transform_5, window_bounds = array<i64: 8, 128>}]} {
    %c0 = arith.constant 0 : index
    %c0_0 = arith.constant 0 : index
    %0 = vector.load %arg1[%c0, %c0_0] : memref<8x32xf32, #tpu.memory_space<vmem>>, vector<8x32xf32>
    %1 = arith.truncf %0 : vector<8x32xf32> to vector<8x32xbf16>
    %c0_1 = arith.constant 0 : index
    %c0_2 = arith.constant 0 : index
    %2 = vector.load %arg2[%c0_1, %c0_2] : memref<32x2048xbf16, #tpu.memory_space<vmem>>, vector<32x2048xbf16>
    %cst = arith.constant dense<0.000000e+00> : vector<8x2048xf32>
    %3 = tpu.matmul %1, %2, %cst {dimension_numbers = #tpu.dot_dimension_numbers<[1], [0], [0], [1], [0, 0, 1, 1], [], []>} : vector<8x32xbf16>, vector<32x2048xbf16>, vector<8x2048xf32> -> vector<8x2048xf32>
    %4 = arith.truncf %3 : vector<8x2048xf32> to vector<8x2048xbf16>
    %c0_3 = arith.constant 0 : index
    %c0_4 = arith.constant 0 : index
    %5 = vector.load %arg3[%c0_3, %c0_4] : memref<1x2048xbf16, #tpu.memory_space<vmem>>, vector<1x2048xbf16>
    %6 = vector.broadcast %5 : vector<1x2048xbf16> to vector<8x2048xbf16>
    %7 = arith.addf %4, %6 : vector<8x2048xbf16>
    %cst_5 = arith.constant 0.000000e+00 : bf16
    %8 = vector.broadcast %cst_5 : bf16 to vector<8x2048xbf16>
    %9 = arith.maximumf %7, %8 : vector<8x2048xbf16>
    %c0_6 = arith.constant 0 : index
    %c0_7 = arith.constant 0 : index
    %10 = vector.load %arg4[%c0_6, %c0_7] : memref<2048x128xbf16, #tpu.memory_space<vmem>>, vector<2048x128xbf16>
    %cst_8 = arith.constant dense<0.000000e+00> : vector<8x128xf32>
    %11 = tpu.matmul %9, %10, %cst_8 {dimension_numbers = #tpu.dot_dimension_numbers<[1], [0], [0], [1], [0, 0, 1, 1], [], []>} : vector<8x2048xbf16>, vector<2048x128xbf16>, vector<8x128xf32> -> vector<8x128xf32>
    %c0_9 = arith.constant 0 : index
    %c0_10 = arith.constant 0 : index
    %12 = vector.load %arg5[%c0_9, %c0_10] : memref<1x128xf32, #tpu.memory_space<vmem>>, vector<1x128xf32>
    %13 = vector.broadcast %12 : vector<1x128xf32> to vector<8x128xf32>
    %14 = arith.addf %11, %13 : vector<8x128xf32>
    %c0_11 = arith.constant 0 : index
    %c0_12 = arith.constant 0 : index
    %15 = vector.load %arg6[%c0_11, %c0_12] : memref<8x128xf32, #tpu.memory_space<vmem>>, vector<8x128xf32>
    tpu.vector_store %arg6[%c0_11, %c0_12], %14 {strides = array<i32>} : memref<8x128xf32, #tpu.memory_space<vmem>>, vector<8x128xf32>,
    return
  }
  func.func @transform_0(%arg0: i32) -> (i32, i32) {
    %c0_i32 = arith.constant 0 : i32
    %c0_i32_0 = arith.constant 0 : i32
    return %arg0, %c0_i32 : i32, i32
  }
  func.func @transform_1(%arg0: i32) -> (i32, i32) {
    %c0_i32 = arith.constant 0 : i32
    %c0_i32_0 = arith.constant 0 : i32
    %c0_i32_1 = arith.constant 0 : i32
    return %c0_i32, %c0_i32_0 : i32, i32
  }
  func.func @transform_2(%arg0: i32) -> (i32, i32) {
    %c0_i32 = arith.constant 0 : i32
    %c0_i32_0 = arith.constant 0 : i32
    %c0_i32_1 = arith.constant 0 : i32
    return %c0_i32, %c0_i32_0 : i32, i32
  }
  func.func @transform_3(%arg0: i32) -> (i32, i32) {
    %c0_i32 = arith.constant 0 : i32
    %c0_i32_0 = arith.constant 0 : i32
    %c0_i32_1 = arith.constant 0 : i32
    return %c0_i32, %c0_i32_0 : i32, i32
  }
  func.func @transform_4(%arg0: i32) -> (i32, i32) {
    %c0_i32 = arith.constant 0 : i32
    %c0_i32_0 = arith.constant 0 : i32
    %c0_i32_1 = arith.constant 0 : i32
    return %c0_i32, %c0_i32_0 : i32, i32
  }
  func.func @transform_5(%arg0: i32) -> (i32, i32) {
    %c0_i32 = arith.constant 0 : i32
    %c0_i32_0 = arith.constant 0 : i32
    return %arg0, %c0_i32 : i32, i32
  }
}

</mosaic_0001>

<bundles_post_ra>
// kernel: token_embedding.1
= control target key start
LH: loop header
LB: loop body
LE: loop exit
PB: predicated region body
PF: predicated region fallthrough
CT: control target
= control target key end

     0   :  { %10 = vsyncpa [#allocation3], 0  ;;  %s3629_s0 = inlined_call_operand.hbm [shape: f32[16,32], index: 0, kind: input, shape index: {}]   ;;  %s3630_s1 = inlined_call_operand.hbm [shape: bf16[32,2048], index: 1, kind: input, shape index: {}]   ;;  %s3631_s2 = inlined_call_operand.hbm [shape: bf16[1,2048], index: 2, kind: input, shape index: {}]   ;;  %s3632_s3 = inlined_call_operand.hbm [shape: bf16[2048,128], index: 3, kind: input, shape index: {}]   ;;  %s3633_s4 = inlined_call_operand.vmem [shape: f32[1,128], index: 4, kind: input, shape index: {}]   ;;  %s3634_s5 = inlined_call_operand.vmem [shape: f32[16,128], index: 5, kind: output, shape index: {}]  }
   0x1   :  { %12 = vsyncpa [#allocation3 + $0x1], 0 }
   0x2   :  { %13 = vsyncpa [#allocation5], 0 }
   0x3   :  { %14 = vsyncpa [#allocation8], 0  ;;  %s3280_s18 = smov 0   ;;  %s3282_s19 = smov 0  }
   0x4   :  { %s3284_s20 = smov 0   ;;  %s3286_s21 = smov 0  }
   0x5 LB: > { %s3299_s22 = sadd.s32 4294967295, %s3239_s21   ;;  %p40_p0 = scmp.ne.s32.totalorder %s3231_s19, %s3227_s18  ;;  %s3239_s21 = sphi %s3286_s21, %s3652_s21   ;;  %s3235_s20 = sphi %s3284_s20, %s3651_s20   ;;  %s3231_s19 = sphi %s3282_s19, %s3650_s19   ;;  %s3227_s18 = sphi %s3280_s18, %s3649_s18  }
   0x6   : > { %p3635_p1 = scmp.eq.s32.totalorder %s3299_s22, 0  ;;  %p2518_p2 = scmp.ge.s32.totalorder %s3239_s21, 1 }
   0x7   : > { %p161_p3 = scmp.lt.s32.totalorder %s3239_s21, 3  ;;  %s3241_s25 = smov [#allocation4]  }
   0x8   : > { %p3307_p4 = por %p3635_p1, %p40_p0  ;;  %s173_s26 = sshll.u32 %s3241_s25, 4  ;;  %s3315_s26 = int_to_ptr.vmem [resolvable:$true] %s173_s26 }
   0x9   : > { %p3311_p5 = pnand %p2518_p2, %p161_p3  ;;  %s3242_s28 = smov [#allocation6]  }
   0xa   : > { %s3638_s23 = scalar_select %p3307_p4, 1, 0 }
   0xb   : > { %s3639_s24 = scalar_select %p3311_p5, 1, 0 }
   0xc   : > { %p2892_p6 = pneg %p3311_p5  ;;  %s187_s29 = sshll.u32 %s3242_s28, 4  ;;  %s3325_s29 = int_to_ptr.vmem [resolvable:$true] %s187_s29 }
   0xd   : > { %s3243_s30 = smov [#allocation7]   ;;  %s3083_s9 = scalar_lea.hbm %s3630_s1, 4096 }
   0xe   : > { %p3321_p7 = pnand %p2892_p6, %p3635_p1  ;;  %s3327_s6 = sshll.u32 %s3243_s30, 4  ;;  %s198_s6 = int_to_ptr.vmem [resolvable:$true] %s3327_s6 }
   0xf   : > { %p3084_p8 = scmp.ne.s32.totalorder %s3630_s1, %s3083_s9  ;;  %p3090_p12 = scmp.lt.u32.totalorder %s3083_s9, %s3630_s1 }
  0x10   : > { %p3337_p9 = pneg %p3321_p7 }
  0x12   : > { %p3086_p10 = pnand %p3337_p9, %p3084_p8 }
  0x14   : > { %p3087_p11 = pneg %p3086_p10 }
  0x16   : > { %p3092_p13 = pnand %p3090_p12, %p3087_p11 }
  0x18   : > { %3095 = shalt.err (!%p3092_p13)
}
  0x19   : > { %s3096_s15 = scalar_lea.vmem %s3315_s26, 4096  ;;  %p3104_p6 = scmp.lt.s32.totalorder %s3315_s26, %s3315_s26 }
  0x1a   : > { %p3097_p0 = scmp.ne.s32.totalorder %s3315_s26, %s3096_s15  ;;  %p3105_p1 = scmp.lt.s32.totalorder %s3096_s15, %s3096_s15 }
  0x1c   : > { %p3099_p2 = pnand %p3097_p0, %p3337_p9  ;;  %p3106_p8 = por %p3105_p1, %p3104_p6 }
  0x1e   : > { %p3100_p3 = pneg %p3099_p2 }
  0x20   : > { %p3107_p10 = pnand %p3106_p8, %p3100_p3 }
  0x22   : > { %3110 = shalt.err (!%p3107_p10)
}
  0x23   : > { %s3244_s16 = smov 1024   ;;  %s3245_s17 = smov 64  }
  0x24   : > { %2895 = dma.hbm_to_vmem [thread:$0]  (!%p3321_p7), %s3630_s1, 4096, %s3315_s26, [#allocation5], %s3244_s16, %s3244_s16, %s3245_s17  }
  0x25   : > { %s3111_s7 = scalar_lea.hbm %s3631_s2, 256 }
  0x26   : > { %p3112_p1 = scmp.ne.s32.totalorder %s3631_s2, %s3111_s7  ;;  %p3118_p13 = scmp.lt.u32.totalorder %s3111_s7, %s3631_s2 }
  0x28   : > { %p3114_p11 = pnand %p3112_p1, %p3337_p9 }
  0x2a   : > { %p3115_p12 = pneg %p3114_p11 }
  0x2c   : > { %p3120_p0 = pnand %p3118_p13, %p3115_p12 }
  0x2e   : > { %3123 = shalt.err (!%p3120_p0)
}
  0x2f   : > { %s3124_s26 = scalar_lea.vmem %s3325_s29, 256  ;;  %p3132_p8 = scmp.lt.s32.totalorder %s3325_s29, %s3325_s29 }
  0x30   : > { %p3125_p2 = scmp.ne.s32.totalorder %s3325_s29, %s3124_s26  ;;  %p3133_p10 = scmp.lt.s32.totalorder %s3124_s26, %s3124_s26 }
  0x32   : > { %p3127_p3 = pnand %p3125_p2, %p3337_p9  ;;  %p3134_p1 = por %p3133_p10, %p3132_p8 }
  0x34   : > { %p3128_p6 = pneg %p3127_p3 }
  0x36   : > { %p3135_p11 = pnand %p3134_p1, %p3128_p6 }
  0x38   : > { %3138 = shalt.err (!%p3135_p11)
}
  0x39   : > { %2898 = dma.hbm_to_vmem [thread:$0]  (!%p3321_p7), %s3631_s2, 256, %s3325_s29, [#allocation5]  }
  0x3a   : > { %s3139_s18 = scalar_lea.hbm %s3632_s3, 16384 }
  0x3b   : > { %p3140_p12 = scmp.ne.s32.totalorder %s3632_s3, %s3139_s18  ;;  %p3146_p2 = scmp.lt.u32.totalorder %s3139_s18, %s3632_s3 }
  0x3d   : > { %p3142_p13 = pnand %p3140_p12, %p3337_p9 }
  0x3f   : > { %p3143_p0 = pneg %p3142_p13 }
  0x41   : > { %p3148_p3 = pnand %p3146_p2, %p3143_p0 }
  0x43   : > { %3151 = shalt.err (!%p3148_p3)
}
  0x44   : > { %s3152_s8 = scalar_lea.vmem %s198_s6, 16384  ;;  %p3160_p1 = scmp.lt.s32.totalorder %s198_s6, %s198_s6 }
  0x45   : > { %p3153_p6 = scmp.ne.s32.totalorder %s198_s6, %s3152_s8  ;;  %p3161_p11 = scmp.lt.s32.totalorder %s3152_s8, %s3152_s8 }
  0x47   : > { %p3155_p8 = pnand %p3153_p6, %p3337_p9  ;;  %p3162_p4 = por %p3161_p11, %p3160_p1 }
  0x49   : > { %p3156_p10 = pneg %p3155_p8 }
  0x4b   : > { %p3163_p5 = pnand %p3162_p4, %p3156_p10 }
  0x4d   : > { %3166 = shalt.err (!%p3163_p5)
}
  0x4e   : > { %s3246_s29 = smov 4   ;;  %s3404_s12 = sadd.s32 1, %s3239_s21  }
  0x4f   : > { %2901 = dma.hbm_to_vmem [thread:$0]  (!%p3321_p7), %s3632_s3, 16384, %s198_s6, [#allocation8], %s3245_s17, %s3245_s17, %s3246_s29  }
  0x50   : > { %s24_s27 = ssub.s32 %s3239_s21, %s3404_s12  ;;  %s27_s11 = sadd.s32 1, %s3235_s20 }
  0x51   : > { %p25_p4 = scmp.eq.s32.totalorder %s24_s27, 0  ;;  %p34_p5 = scmp.ne.s32.totalorder %s3235_s20, %s3231_s19 }
  0x52   : > { %p35_p9 = scmp.eq.s32.totalorder %s3239_s21, 0  ;;  %p2909_p13 = scmp.lt.s32.totalorder %s3239_s21, 2 }
  0x53   : > { %s3413_s26 = scalar_select %p25_p4, %s3235_s20, %s27_s11  }
  0x54   : > { %p36_p12 = por %p35_p9, %p34_p5  ;;  %s214_s13 = sand.u32 1, %s3235_s20  }
  0x55   : > { %s2524_s14 = sshll.u32 %s3239_s21, 7  ;;  %s2523_s15 = sshll.u32 %s214_s13, 3 }
  0x56   : > { %s3421_s25 = scalar_lea.hbm %s3629_s0, %s2524_s14  ;;  %s218_s6 = scalar_lea.vmem [#allocation2], %s2523_s15 }
  0x57   : > { %s225_s17 = sshll.u32 %s218_s6, 4  ;;  %p3423_p7 = pnand %p2909_p13, %p36_p12  ;;  %s3427_s17 = int_to_ptr.vmem [resolvable:$true] %s225_s17 }
  0x58   : > { %s215_s21 = scalar_lea.sflag [#allocation3], %s214_s13  ;;  %s3167_s30 = scalar_lea.hbm %s3421_s25, 128 }
  0x59   : > { %p3168_p0 = scmp.ne.s32.totalorder %s3421_s25, %s3167_s30  ;;  %p3169_p2 = pneg %p3423_p7 }
  0x5a   : > { %s3172_s29 = scalar_lea.hbm %s3629_s0, 256  ;;  %p3173_p8 = scmp.lt.u32.totalorder %s3421_s25, %s3629_s0 }
  0x5b   : > { %p3170_p3 = pnand %p3169_p2, %p3168_p0  ;;  %p3174_p10 = scmp.lt.u32.totalorder %s3172_s29, %s3167_s30 }
  0x5c   : > { %p3176_p11 = scmp.lt.u32.totalorder %s3167_s30, %s3421_s25 }
  0x5d   : > { %p3171_p6 = pneg %p3170_p3  ;;  %p3175_p1 = por %p3174_p10, %p3173_p8 }
  0x5f   : > { %p3177_p4 = por %p3176_p11, %p3175_p1 }
  0x61   : > { %p3178_p5 = pnand %p3177_p4, %p3171_p6 }
  0x63   : > { %3181 = shalt.err (!%p3178_p5)
}
  0x64   : > { %s3182_s27 = scalar_lea.vmem %s3427_s17, 128  ;;  %s3247_s11 = smov [#allocation2]  }
  0x65   : > { %p3183_p9 = scmp.ne.s32.totalorder %s3427_s17, %s3182_s27  ;;  %s3187_s13 = sshll.u32 %s3247_s11, 4  ;;  %s3188_s13 = int_to_ptr.vmem [resolvable:$false] %s3187_s13 }
  0x66   : > { %s3189_s14 = scalar_lea.vmem %s3188_s13, 256  ;;  %p3190_p0 = scmp.lt.s32.totalorder %s3427_s17, %s3188_s13 }
  0x67   : > { %p3185_p12 = pnand %p3183_p9, %p3169_p2  ;;  %p3191_p3 = scmp.lt.s32.totalorder %s3189_s14, %s3182_s27 }
  0x69   : > { %p3186_p13 = pneg %p3185_p12  ;;  %p3192_p8 = por %p3191_p3, %p3190_p0 }
  0x6b   : > { %p3193_p10 = pnand %p3192_p8, %p3186_p13 }
  0x6d   : > { %3196 = shalt.err (!%p3193_p10)
}
  0x6e   : > { %2905 = dma.hbm_to_vmem [thread:$0]  (!%p3423_p7), %s3421_s25, 128, %s3427_s17, %s215_s21  }
  0x6f   : > { %p3643_p6 = scmp.ne.s32.totalorder %s3639_s24, 0 }
  0x70   : > { %s236_s15 = sand.u32 (!%p3643_p6), 1, %s3231_s19   ;;  %p3644_p2 = scmp.ne.s32.totalorder (!%p3643_p6), %s3638_s23, 0 }
  0x71   : > { %234 = sbr.rel (%p3643_p6) target bundleno = 675 (0x2a3), region = 40  ;;  %s3457_s16 = sshll.u32 (!%p3643_p6), %s236_s15, 3 }
  0x72   : > { %s237_s18 = scalar_lea.sflag (!%p3643_p6), [#allocation3], %s236_s15  ;;  %s240_s6 = scalar_lea.vmem (!%p3643_p6), [#allocation2], %s3457_s16 }
  0x78   : > { %3214 = dma.done.wait (%p3644_p2), %s237_s18, 128  }
  0x79   : > { %3216 = vsyncadd (%p3644_p2), %s237_s18, 4294967168  ;;  %p3645_p1 = scmp.eq.s32.totalorder %s3299_s22, 0 }
  0x7b   : > { %3218 = dma.done.wait (%p3645_p1), [#allocation5], 4352   ;;  %p3646_p7 = pmov %p3645_p1 }
  0x7c   : > { %p3647_p11 = pmov %p3645_p1 }
  0x7d   : > { %3220 = vsyncadd (%p3646_p7), [#allocation5], 4294962944 }
  0x7e   : > { %3222 = dma.done.wait (%p3647_p11), [#allocation8], 16384   ;;  %p3648_p4 = pmov %p3645_p1 }
  0x7f   : > { %v3248_v0 = vmov 0   ;;  %v285_v1 = vld [vmem:[#allocation4] sm:$0xff]  ;;  %v286_v3 = vld [vmem:[#allocation4 + $0x8] sm:$0xff]  ;;  %v287_v15 = vld [vmem:[#allocation4 + $0x10] sm:$0xff]  ;;  %vm477_vm0 = vcmask 261120   ;;  %p278_p5 = scmp.lt.s32.totalorder %s3299_s22, 1 }
  0x80   : > { %3224 = vsyncadd (%p3648_p4), [#allocation8], 4294950912  ;;  %513 = vmatprep.mubr.bf16.mxu0 %v3248_v0  ;;  %554 = vmatprep.mubr.bf16.mxu1 %v3248_v0  ;;  %v293_v2 = vld [vmem:[#allocation4 + $0x40] sm:$0xff]  ;;  %v294_v5 = vld [vmem:[#allocation4 + $0x48] sm:$0xff] }
  0x81   : > { %v2532_v4 = vcombine.high %v285_v1, %v293_v2  ;;  %v2531_v6 = vcombine.low %v285_v1, %v293_v2  ;;  %v301_v7 = vld [vmem:[#allocation4 + $0x80] sm:$0xff]  ;;  %v2534_v9 = vcombine.high %v286_v3, %v294_v5  ;;  %v2533_v10 = vcombine.low %v286_v3, %v294_v5  ;;  %v302_v12 = vld [vmem:[#allocation4 + $0x88] sm:$0xff]  ;;  %v295_v16 = vld [vmem:[#allocation4 + $0x50] sm:$0xff]  ;;  %s3654_s22 = smov (!%p278_p5, %s3299_s22), 1 }
  0x82   : > { %v309_v8 = vld [vmem:[#allocation4 + $0xc0] sm:$0xff]  ;;  %v310_v13 = vld [vmem:[#allocation4 + $0xc8] sm:$0xff]  ;;  %v288_v17 = vld [vmem:[#allocation4 + $0x18] sm:$0xff]  ;;  %v2536_v22 = vcombine.high %v287_v15, %v295_v16  ;;  %v2535_v29 = vcombine.low %v287_v15, %v295_v16  ;;  %s2530_s25 = sshll.u32 %s3654_s22, 3 }
  0x83   : > { %v2548_v11 = vcombine.high %v301_v7, %v309_v8  ;;  %481 = vmatprep.subr.bf16.mxu0 %v2532_v4  ;;  %v2550_v14 = vcombine.high %v302_v12, %v310_v13  ;;  %522 = vmatprep.subr.bf16.mxu1 %v2534_v9  ;;  %v2547_v18 = vcombine.low %v301_v7, %v309_v8  ;;  %v283_v19 = vld [vmem:[%s240_s6] sm:$0xff]  ;;  %v289_v33 = vld [vmem:[#allocation4 + $0x20] sm:$0xff]  ;;  %v290_v35 = vld [vmem:[#allocation4 + $0x28] sm:$0xff]  ;;  %s281_s21 = scalar_lea.vmem %s3634_s5, %s2530_s25 }
  0x84   : > { %482 = vmatpush1.bf16.msra.mxu0 %v2531_v6  ;;  %v296_v20 = vld [vmem:[#allocation4 + $0x58] sm:$0xff]  ;;  %523 = vmatpush1.bf16.msra.mxu1 %v2533_v10  ;;  %v2549_v21 = vcombine.low %v302_v12, %v310_v13  ;;  %v303_v24 = vld [vmem:[#allocation4 + $0x90] sm:$0xff]  ;;  %v3476_v26 = vpack.c.bf16 %v283_v19, %v283_v19  ;;  %v297_v34 = vld [vmem:[#allocation4 + $0x60] sm:$0xff] }
  0x85   : > { %483 = vmatprep.subr.bf16.mxu0 %v2548_v11  ;;  %524 = vmatprep.subr.bf16.mxu1 %v2550_v14  ;;  %v2538_v23 = vcombine.high %v288_v17, %v296_v20  ;;  %v311_v25 = vld [vmem:[#allocation4 + $0xd0] sm:$0xff]  ;;  %v304_v27 = vld [vmem:[#allocation4 + $0x98] sm:$0xff]  ;;  %v2537_v30 = vcombine.low %v288_v17, %v296_v20  ;;  %v298_v36 = vld [vmem:[#allocation4 + $0x68] sm:$0xff]  ;;  %v2540_v40 = vcombine.high %v289_v33, %v297_v34 }
  0x86   : > { %v312_v28 = vld [vmem:[#allocation4 + $0xd8] sm:$0xff]  ;;  %v2552_v31 = vcombine.high %v303_v24, %v311_v25  ;;  %v2551_v37 = vcombine.low %v303_v24, %v311_v25  ;;  %v305_v38 = vld [vmem:[#allocation4 + $0xa0] sm:$0xff]  ;;  %v2542_v42 = vcombine.high %v290_v35, %v298_v36  ;;  %v306_v43 = vld [vmem:[#allocation4 + $0xa8] sm:$0xff]  ;;  %v2539_v45 = vcombine.low %v289_v33, %v297_v34 }
  0x87   : > { %v2554_v32 = vcombine.high %v304_v27, %v312_v28  ;;  %v2553_v39 = vcombine.low %v304_v27, %v312_v28  ;;  %v313_v41 = vld [vmem:[#allocation4 + $0xe0] sm:$0xff]  ;;  %v314_v44 = vld [vmem:[#allocation4 + $0xe8] sm:$0xff]  ;;  %v291_v46 = vld [vmem:[#allocation4 + $0x30] sm:$0xff]  ;;  %v2541_v47 = vcombine.low %v290_v35, %v298_v36 }
  0x88   : > { %484 = vmatpush1.bf16.msra.mxu0 %v2547_v18  ;;  %525 = vmatpush1.bf16.msra.mxu1 %v2549_v21  ;;  %v2556_v48 = vcombine.high %v305_v38, %v313_v41  ;;  %v299_v49 = vld [vmem:[#allocation4 + $0x70] sm:$0xff]  ;;  %v2558_v50 = vcombine.high %v306_v43, %v314_v44  ;;  %v292_v51 = vld [vmem:[#allocation4 + $0x38] sm:$0xff]  ;;  %v2555_v53 = vcombine.low %v305_v38, %v313_v41  ;;  %v2961_v12 = vld [vmem:[#allocation7 + $0x50] sm:$0xff]   ;;  %v3249_v38 = vmov 1966171168  }
  0x89   : > { %563 = vmatprep.subr.bf16.mxu0 %v2536_v22  ;;  %604 = vmatprep.subr.bf16.mxu1 %v2538_v23  ;;  %v300_v52 = vld [vmem:[#allocation4 + $0x78] sm:$0xff]  ;;  %v307_v54 = vld [vmem:[#allocation4 + $0xb0] sm:$0xff]  ;;  %v2557_v55 = vcombine.low %v306_v43, %v314_v44  ;;  %v2544_v56 = vcombine.high %v291_v46, %v299_v49  ;;  %v2543_v61 = vcombine.low %v291_v46, %v299_v49  ;;  %v2962_v13 = vld [vmem:[#allocation7 + $0xd0] sm:$0xff]  }
  0x8a   : > { %v315_v57 = vld [vmem:[#allocation4 + $0xf0] sm:$0xff]  ;;  %v2546_v58 = vcombine.high %v292_v51, %v300_v52  ;;  %v308_v59 = vld [vmem:[#allocation4 + $0xb8] sm:$0xff]  ;;  %v2545_v62 = vcombine.low %v292_v51, %v300_v52  ;;  %v2963_v14 = vld [vmem:[#allocation7 + $0x10] sm:$0xff]  }
  0x8b   : > { %2563 = vmatmul.mubr.msk.bf16.vlgmr.msra.gmra.mrb[0].mxu0 %vm477_vm0, %v3476_v26  ;;  %2564 = vmatmul.mubr.msk.bf16.vlgmr.msra.gmra.mrb[0].mxu1 %vm477_vm0, %v3476_v26  ;;  %v316_v60 = vld [vmem:[#allocation4 + $0xf8] sm:$0xff]  ;;  %v2560_v63 = vcombine.high %v307_v54, %v315_v57  ;;  %v2559_v2 = vcombine.low %v307_v54, %v315_v57  ;;  %v2953_v3 = vld [vmem:[#allocation7 + $0x40] sm:$0xff]   ;;  %v2964_v15 = vld [vmem:[#allocation7 + $0x90] sm:$0xff]  }
  0x8c   : > { %564 = vmatpush1.bf16.msra.mxu0 %v2535_v29  ;;  %605 = vmatpush1.bf16.msra.mxu1 %v2537_v30  ;;  %v2562_v1 = vcombine.high %v308_v59, %v316_v60  ;;  %v2561_v4 = vcombine.low %v308_v59, %v316_v60  ;;  %v2954_v5 = vld [vmem:[#allocation7 + $0xc0] sm:$0xff]   ;;  %v2957_v8 = vld [vmem:[#allocation7 + $0x48] sm:$0xff]   ;;  %v2965_v16 = vld [vmem:[#allocation7 + $0x58] sm:$0xff]  }
  0x8d   : > { %565 = vmatprep.subr.bf16.mxu0 %v2552_v31  ;;  %606 = vmatprep.subr.bf16.mxu1 %v2554_v32  ;;  %v2955_v6 = vld [vmem:[#allocation7] sm:$0xff]   ;;  %v2958_v9 = vld [vmem:[#allocation7 + $0xc8] sm:$0xff]   ;;  %v2966_v17 = vld [vmem:[#allocation7 + $0xd8] sm:$0xff]  }
  0x8e   : > { %595 = vmatprep.mubr.bf16.mxu0 %v3248_v0  ;;  %636 = vmatprep.mubr.bf16.mxu1 %v3248_v0  ;;  %v2956_v7 = vld [vmem:[#allocation7 + $0x80] sm:$0xff]   ;;  %v2959_v10 = vld [vmem:[#allocation7 + $0x8] sm:$0xff]   ;;  %v2967_v18 = vld [vmem:[#allocation7 + $0x18] sm:$0xff]  }
  0x8f   : > { %v2960_v11 = vld [vmem:[#allocation7 + $0x88] sm:$0xff]   ;;  %v2968_v19 = vld [vmem:[#allocation7 + $0x98] sm:$0xff]   ;;  %v2969_v20 = vld [vmem:[#allocation7 + $0x60] sm:$0xff]  }
  0x90   : > { %566 = vmatpush1.bf16.msra.mxu0 %v2551_v37  ;;  %607 = vmatpush1.bf16.msra.mxu1 %v2553_v39  ;;  %v2970_v21 = vld [vmem:[#allocation7 + $0xe0] sm:$0xff]   ;;  %v2973_v24 = vld [vmem:[#allocation7 + $0x68] sm:$0xff]   ;;  %v2977_v28 = vld [vmem:[#allocation7 + $0x70] sm:$0xff]   ;;  %v831_v39 = vunpack.c.l.s4 %v3249_v38 }
  0x91   : > { %645 = vmatprep.subr.bf16.mxu0 %v2540_v40  ;;  %686 = vmatprep.subr.bf16.mxu1 %v2542_v42  ;;  %v2971_v22 = vld [vmem:[#allocation7 + $0x20] sm:$0xff]   ;;  %v2974_v25 = vld [vmem:[#allocation7 + $0xe8] sm:$0xff]   ;;  %v2978_v29 = vld [vmem:[#allocation7 + $0xf0] sm:$0xff]   ;;  %v833_v40 = vlaneseq }
  0x92   : > { %v2972_v23 = vld [vmem:[#allocation7 + $0xa0] sm:$0xff]   ;;  %v2976_v27 = vld [vmem:[#allocation7 + $0xa8] sm:$0xff]   ;;  %v2979_v30 = vld [vmem:[#allocation7 + $0x30] sm:$0xff]   ;;  %v832_v41 = vunpack.c.0.s8 %v831_v39 }
  0x93   : > { %2565 = vmatmul.mubr.msk.bf16.vlgmr.msra.gmra.mrb[4].mxu0 %vm477_vm0, %v3476_v26  ;;  %2566 = vmatmul.mubr.msk.bf16.vlgmr.msra.gmra.mrb[4].mxu1 %vm477_vm0, %v3476_v26  ;;  %v2980_v31 = vld [vmem:[#allocation7 + $0xb0] sm:$0xff]   ;;  %v2981_v32 = vld [vmem:[#allocation7 + $0x78] sm:$0xff]   ;;  %v2985_v36 = vld [vmem:[#allocation7 + $0x140] sm:$0xff]   ;;  %v834_v42 = vshrl.u32 %v833_v40, 7 }
  0x94   : > { %646 = vmatpush1.bf16.msra.mxu0 %v2539_v45  ;;  %687 = vmatpush1.bf16.msra.mxu1 %v2541_v47  ;;  %v2982_v33 = vld [vmem:[#allocation7 + $0xf8] sm:$0xff]   ;;  %v2986_v37 = vld [vmem:[#allocation7 + $0x1c0] sm:$0xff]   ;;  %v825_v44 = vld [vmem:[#allocation6] sm:$0xff] }
  0x95   : > { %647 = vmatprep.subr.bf16.mxu0 %v2556_v48  ;;  %688 = vmatprep.subr.bf16.mxu1 %v2558_v50  ;;  %v2983_v34 = vld [vmem:[#allocation7 + $0x38] sm:$0xff]   ;;  %v3500_v43 = vsub.s32 %v832_v41, %v834_v42  ;;  %v829_v47 = vcombine.high %v825_v44, %v825_v44  ;;  %v2992_v38 = vld [vmem:[#allocation7 + $0x188] sm:$0xff]   ;;  %v2993_v39 = vld [vmem:[#allocation7 + $0x150] sm:$0xff]  }
  0x96   : > { %677 = vmatprep.mubr.bf16.mxu0 %v3248_v0  ;;  %718 = vmatprep.mubr.bf16.mxu1 %v3248_v0  ;;  %v2984_v35 = vld [vmem:[#allocation7 + $0xb8] sm:$0xff]  }
  0x97   : > { %v836_v45 = vrot.slane %v825_v44, %v3500_v43  ;;  %v3506_v50 = vrot.slane %v829_v47, %v3500_v43  ;;  %v2994_v44 = vld [vmem:[#allocation7 + $0x1d0] sm:$0xff]  }
  0x98   : > { %648 = vmatpush1.bf16.msra.mxu0 %v2555_v53  ;;  %689 = vmatpush1.bf16.msra.mxu1 %v2557_v55  ;;  %v3510_v55 = vsub.s32 0, %v834_v42 }
  0x99   : > { %727 = vmatprep.subr.bf16.mxu0 %v2544_v56  ;;  %768 = vmatprep.subr.bf16.mxu1 %v2546_v58  ;;  %v844_v46 = vcombine.high %v836_v45, %v836_v45  ;;  %v852_v48 = vrot.slane %v836_v45, %v3500_v43  ;;  %v845_v53 = vcombine.high %v3506_v50, %v3506_v50 }
  0x9b   : > { %2567 = vmatmul.mubr.msk.bf16.vlgmr.msra.gmra.mrb[8].mxu0 %vm477_vm0, %v3476_v26  ;;  %2568 = vmatmul.mubr.msk.bf16.vlgmr.msra.gmra.mrb[8].mxu1 %vm477_vm0, %v3476_v26  ;;  %v866_v49 = vrot.slane %v844_v46, %v3500_v43  ;;  %v874_v51 = vcombine.high %v852_v48, %v852_v48  ;;  %v928_v54 = vpack.i.b16 %v852_v48, %v852_v48 }
  0x9c   : > { %728 = vmatpush1.bf16.msra.mxu0 %v2543_v61  ;;  %769 = vmatpush1.bf16.msra.mxu1 %v2545_v62  ;;  %v873_v59 = vrot.slane %v845_v53, %v3500_v43  ;;  %v2997_v53 = vld [vmem:[#allocation7 + $0x158] sm:$0xff]  }
  0x9d   : > { %729 = vmatprep.subr.bf16.mxu0 %v2560_v63  ;;  %770 = vmatprep.subr.bf16.mxu1 %v2562_v1  ;;  %v876_v52 = vcombine.high %v866_v49, %v866_v49  ;;  %v942_v56 = vpack.i.b16 %v874_v51, %v874_v51  ;;  %v935_v57 = vpack.i.b16 %v866_v49, %v866_v49  ;;  %v2995_v49 = vld [vmem:[#allocation7 + $0x110] sm:$0xff]  }
  0x9e   : > { %759 = vmatprep.mubr.bf16.mxu0 %v3248_v0  ;;  %800 = vmatprep.mubr.bf16.mxu1 %v3248_v0  ;;  %v933_v60 = vrot.slane %v928_v54, %v3510_v55 }
  0x9f   : > { %v949_v58 = vpack.i.b16 %v876_v52, %v876_v52  ;;  %v947_v62 = vrot.slane %v942_v56, %v3510_v55  ;;  %v940_v63 = vrot.slane %v935_v57, %v3510_v55  ;;  %v2996_v52 = vld [vmem:[#allocation7 + $0x190] sm:$0xff]   ;;  %v2998_v56 = vld [vmem:[#allocation7 + $0x1d8] sm:$0xff]  }
  0xa0   : > { %730 = vmatpush1.bf16.msra.mxu0 %v2559_v2  ;;  %771 = vmatpush1.bf16.msra.mxu1 %v2561_v4 }
  0xa1   : > { %2702 = vmatprep.subr.bf16.mxu0 %v2953_v3  ;;  %2724 = vmatprep.subr.bf16.mxu1 %v2954_v5  ;;  %v954_v4 = vrot.slane %v949_v58, %v3510_v55  ;;  %v877_v5 = vcombine.high %v873_v59, %v873_v59 }
  0xa3   : > { %2569 = vmatmul.mubr.msk.bf16.vlgmr.msra.gmra.mrb[12].mxu0 %vm477_vm0, %v3476_v26  ;;  %2570 = vmatmul.mubr.msk.bf16.vlgmr.msra.gmra.mrb[12].mxu1 %vm477_vm0, %v3476_v26  ;;  %v2975_v26 = vld [vmem:[#allocation7 + $0x28] sm:$0xff]  }
  0xa4   : > { %2703 = vmatpush3.bf16.msra.mxu0 %v2955_v6  ;;  %2725 = vmatpush3.bf16.msra.mxu1 %v2956_v7 }
  0xa5   : > { %2704 = vmatprep.subr.bf16.mxu0 %v2957_v8  ;;  %2726 = vmatprep.subr.bf16.mxu1 %v2958_v9 }
  0xa8   : > { %2705 = vmatpush3.bf16.msra.mxu0 %v2959_v10  ;;  %2727 = vmatpush3.bf16.msra.mxu1 %v2960_v11 }
  0xa9   : > { %2706 = vmatprep.subr.bf16.mxu0 %v2961_v12  ;;  %2728 = vmatprep.subr.bf16.mxu1 %v2962_v13 }
  0xac   : > { %2707 = vmatpush3.bf16.msra.mxu0 %v2963_v14  ;;  %2729 = vmatpush3.bf16.msra.mxu1 %v2964_v15 }
  0xad   : > { %2708 = vmatprep.subr.bf16.mxu0 %v2965_v16  ;;  %2730 = vmatprep.subr.bf16.mxu1 %v2966_v17  ;;  %v963_v17 = vpack.i.b16 %v873_v59, %v873_v59 }
  0xb0   : > { %2709 = vmatpush3.bf16.msra.mxu0 %v2967_v18  ;;  %2731 = vmatpush3.bf16.msra.mxu1 %v2968_v19  ;;  %v977_v19 = vpack.i.b16 %v877_v5, %v877_v5 }
  0xb1   : > { %2710 = vmatprep.subr.bf16.mxu0 %v2969_v20  ;;  %2732 = vmatprep.subr.bf16.mxu1 %v2970_v21 }
  0xb4   : > { %2711 = vmatpush3.bf16.msra.mxu0 %v2971_v22  ;;  %2733 = vmatpush3.bf16.msra.mxu1 %v2972_v23  ;;  %v2987_v22 = vld [vmem:[#allocation7 + $0x100] sm:$0xff]  }
  0xb5   : > { %2712 = vmatprep.subr.bf16.mxu0 %v2973_v24  ;;  %2734 = vmatprep.subr.bf16.mxu1 %v2974_v25  ;;  %v2988_v25 = vld [vmem:[#allocation7 + $0x180] sm:$0xff]  }
  0xb8   : > { %2713 = vmatpush3.bf16.msra.mxu0 %v2975_v26  ;;  %2735 = vmatpush3.bf16.msra.mxu1 %v2976_v27  ;;  %v2989_v26 = vld [vmem:[#allocation7 + $0x148] sm:$0xff]  }
  0xb9   : > { %2714 = vmatprep.subr.bf16.mxu0 %v2977_v28  ;;  %2736 = vmatprep.subr.bf16.mxu1 %v2978_v29  ;;  %v2990_v27 = vld [vmem:[#allocation7 + $0x1c8] sm:$0xff]   ;;  %v968_v29 = vrot.slane %v963_v17, %v3510_v55 }
  0xbc   : > { %2715 = vmatpush3.bf16.msra.mxu0 %v2979_v30  ;;  %2737 = vmatpush3.bf16.msra.mxu1 %v2980_v31 }
  0xbd   : > { %2716 = vmatprep.subr.bf16.mxu0 %v2981_v32  ;;  %2738 = vmatprep.subr.bf16.mxu1 %v2982_v33  ;;  %v982_v32 = vrot.slane %v977_v19, %v3510_v55  ;;  %v2991_v33 = vld [vmem:[#allocation7 + $0x108] sm:$0xff]  }
  0xc0   : > { %2717 = vmatpush3.bf16.msra.mxu0 %v2983_v34  ;;  %2739 = vmatpush3.bf16.msra.mxu1 %v2984_v35 }
  0xc1   : > { %2746 = vmatprep.subr.bf16.mxu0 %v2985_v36  ;;  %2768 = vmatprep.subr.bf16.mxu1 %v2986_v37  ;;  %v3527_v37 = vld [vmem:[#allocation6 + $0x8] sm:$0xff] }
  0xc2   : > { %v3531_v48 = vrot.slane %v3527_v37, %v3500_v43 }
  0xc4   : > { %v893_v59 = vcombine.high %v3531_v48, %v3531_v48 }
 0x15e   : > { %v515_v61 = vpop.f32.mrb[0].mxu0  ;;  %v556_v2 = vpop.f32.mrb[0].mxu1 }
 0x15f   : > { %v809_v1 = vpack.c.bf16 %v515_v61, %v515_v61  ;;  %v517_v3 = vpop.f32.mrb[1].mxu0  ;;  %v811_v6 = vpack.c.bf16 %v556_v2, %v556_v2  ;;  %v558_v8 = vpop.f32.mrb[1].mxu1  ;;  %v2999_v61 = vld [vmem:[#allocation7 + $0x118] sm:$0xff]  }
 0x160   : > { %v810_v7 = vpack.c.bf16 %v517_v3, %v517_v3  ;;  %v519_v9 = vpop.f32.mrb[2].mxu0  ;;  %v812_v11 = vpack.c.bf16 %v558_v8, %v558_v8  ;;  %v560_v12 = vpop.f32.mrb[2].mxu1  ;;  %v3000_v2 = vld [vmem:[#allocation7 + $0x198] sm:$0xff]   ;;  %v3001_v3 = vld [vmem:[#allocation7 + $0x160] sm:$0xff]   ;;  %v915_v8 = vrot.slane %v893_v59, %v3500_v43 }
 0x161   : > { %v1039_v10 = vadd.bf16 %v933_v60, %v809_v1  ;;  %v520_v13 = vpop.f32.mrb[3].mxu0  ;;  %v1041_v14 = vadd.bf16 %v947_v62, %v811_v6  ;;  %v561_v16 = vpop.f32.mrb[3].mxu1  ;;  %v859_v62 = vrot.slane %v3506_v50, %v3500_v43  ;;  %v3002_v6 = vld [vmem:[#allocation7 + $0x1e0] sm:$0xff]   ;;  %v3006_v12 = vld [vmem:[#allocation7 + $0x1e8] sm:$0xff]  }
 0x162   : > { %v1040_v15 = vadd.bf16 %v940_v63, %v810_v7  ;;  %v1042_v18 = vadd.bf16 %v954_v4, %v812_v11  ;;  %v3003_v9 = vld [vmem:[#allocation7 + $0x120] sm:$0xff]   ;;  %v3005_v11 = vld [vmem:[#allocation7 + $0x168] sm:$0xff]  }
 0x163   : > { %v1057_v20 = vmax.bf16 %v3248_v0, %v1041_v14  ;;  %v1055_v23 = vmax.bf16 %v3248_v0, %v1039_v10  ;;  %v875_v10 = vcombine.high %v859_v62, %v859_v62  ;;  %v3004_v50 = vld [vmem:[#allocation7 + $0x1a0] sm:$0xff]   ;;  %v956_v14 = vpack.i.b16 %v859_v62, %v859_v62  ;;  %v3023_v62 = vld [vmem:[#allocation7 + $0x2c8] sm:$0xff]  }
 0x164   : > { %v1056_v21 = vmax.bf16 %v3248_v0, %v1040_v15  ;;  %v1058_v24 = vmax.bf16 %v3248_v0, %v1042_v18  ;;  %v925_v15 = vcombine.high %v915_v8, %v915_v8  ;;  %v3008_v18 = vld [vmem:[#allocation7 + $0x128] sm:$0xff]   ;;  %v3021_v59 = vld [vmem:[#allocation7 + $0x280] sm:$0xff]  }
 0x165   : > { %v970_v19 = vpack.i.b16 %v875_v10, %v875_v10  ;;  %v3031_v10 = vld [vmem:[#allocation7 + $0x2d8] sm:$0xff]  }
 0x166   : > { %2134 = vmatprep.mubr.bf16.mxu0 %v1056_v21  ;;  %v3521_v28 = vpop.f32.mrb[4].mxu0  ;;  %2174 = vmatprep.mubr.bf16.mxu1 %v1058_v24  ;;  %v3524_v31 = vpop.f32.mrb[4].mxu1 }
 0x167   : > { %2135 = vmatmul.mubr.bf16.vlgmr.msra.gmra.mrb[16].mxu0 %v1055_v23  ;;  %v599_v30 = vpop.f32.mrb[5].mxu0  ;;  %2175 = vmatmul.mubr.bf16.vlgmr.msra.gmra.mrb[16].mxu1 %v1057_v20  ;;  %v640_v36 = vpop.f32.mrb[5].mxu1  ;;  %v3010_v23 = vld [vmem:[#allocation7 + $0x170] sm:$0xff]  }
 0x168   : > { %2747 = vmatpush3.bf16.msra.mxu0 %v2987_v22  ;;  %v814_v34 = vpack.c.bf16 %v599_v30, %v599_v30  ;;  %v601_v35 = vpop.f32.mrb[6].mxu0  ;;  %2769 = vmatpush3.bf16.msra.mxu1 %v2988_v25  ;;  %v816_v41 = vpack.c.bf16 %v640_v36, %v640_v36  ;;  %v642_v42 = vpop.f32.mrb[6].mxu1  ;;  %v3009_v22 = vld [vmem:[#allocation7 + $0x1a8] sm:$0xff]   ;;  %v813_v30 = vpack.c.bf16 %v3521_v28, %v3521_v28  ;;  %v3012_v36 = vld [vmem:[#allocation7 + $0x130] sm:$0xff]  }
 0x169   : > { %2748 = vmatprep.subr.bf16.mxu0 %v2989_v26  ;;  %v602_v40 = vpop.f32.mrb[7].mxu0  ;;  %2770 = vmatprep.subr.bf16.mxu1 %v2990_v27  ;;  %v643_v46 = vpop.f32.mrb[7].mxu1  ;;  %v3011_v26 = vld [vmem:[#allocation7 + $0x1f0] sm:$0xff]   ;;  %v991_v27 = vpack.i.b16 %v915_v8, %v915_v8  ;;  %v975_v35 = vrot.slane %v970_v19, %v3510_v55 }
 0x16a   : > { %v1044_v45 = vadd.bf16 %v968_v29, %v814_v34  ;;  %v1046_v47 = vadd.bf16 %v982_v32, %v816_v41  ;;  %v961_v32 = vrot.slane %v956_v14, %v3510_v55  ;;  %v815_v34 = vpack.c.bf16 %v3524_v31, %v3524_v31  ;;  %v3015_v40 = vld [vmem:[#allocation7 + $0x1f8] sm:$0xff]   ;;  %v3028_v8 = vld [vmem:[#allocation7 + $0x210] sm:$0xff]  }
 0x16b   : > { %v996_v28 = vrot.slane %v991_v27, %v3510_v55  ;;  %v3016_v46 = vld [vmem:[#allocation7 + $0x138] sm:$0xff]  }
 0x16c   : > { %2749 = vmatpush3.bf16.msra.mxu0 %v2991_v33  ;;  %v1060_v51 = vmax.bf16 %v3248_v0, %v1044_v45  ;;  %2771 = vmatpush3.bf16.msra.mxu1 %v2992_v38  ;;  %v1062_v54 = vmax.bf16 %v3248_v0, %v1046_v47  ;;  %v1005_v33 = vpack.i.b16 %v925_v15, %v925_v15  ;;  %v3013_v38 = vld [vmem:[#allocation7 + $0x1b0] sm:$0xff]   ;;  %v3017_v47 = vld [vmem:[#allocation7 + $0x1b8] sm:$0xff]   ;;  %v3034_v15 = vld [vmem:[#allocation7 + $0x260] sm:$0xff]  }
 0x16d   : > { %2750 = vmatprep.subr.bf16.mxu0 %v2993_v39  ;;  %2772 = vmatprep.subr.bf16.mxu1 %v2994_v44  ;;  %v3014_v39 = vld [vmem:[#allocation7 + $0x178] sm:$0xff]   ;;  %v1043_v42 = vadd.bf16 %v961_v32, %v813_v30  ;;  %v1045_v45 = vadd.bf16 %v975_v35, %v815_v34  ;;  %v3041_v30 = vld [vmem:[#allocation7 + $0x2a8] sm:$0xff]   ;;  %v3042_v32 = vld [vmem:[#allocation7 + $0x270] sm:$0xff]  }
 0x16e   : > { %2214 = vmatprep.mubr.bf16.mxu0 %v1060_v51  ;;  %v3535_v57 = vpop.f32.mrb[8].mxu0  ;;  %2254 = vmatprep.mubr.bf16.mxu1 %v1062_v54  ;;  %v3541_v60 = vpop.f32.mrb[8].mxu1  ;;  %v1010_v31 = vrot.slane %v1005_v33, %v3510_v55  ;;  %v3019_v51 = vld [vmem:[#allocation7 + $0x2c0] sm:$0xff]   ;;  %v3033_v14 = vld [vmem:[#allocation7 + $0x298] sm:$0xff]   ;;  %v3043_v33 = vld [vmem:[#allocation7 + $0x2f0] sm:$0xff]  }
 0x16f   : > { %v3537_v58 = vpop.f32.mrb[9].mxu0  ;;  %v3545_v1 = vpop.f32.mrb[9].mxu1  ;;  %v817_v35 = vpack.c.bf16 %v3535_v57, %v3535_v57 }
 0x170   : > { %2751 = vmatpush3.bf16.msra.mxu0 %v2995_v49  ;;  %v683_v63 = vpop.f32.mrb[10].mxu0  ;;  %2773 = vmatpush3.bf16.msra.mxu1 %v2996_v52  ;;  %v724_v5 = vpop.f32.mrb[10].mxu1  ;;  %v818_v41 = vpack.c.bf16 %v3537_v58, %v3537_v58  ;;  %v820_v44 = vpack.c.bf16 %v3545_v1, %v3545_v1  ;;  %v3018_v49 = vld [vmem:[#allocation7 + $0x240] sm:$0xff]  }
 0x171   : > { %2752 = vmatprep.subr.bf16.mxu0 %v2997_v53  ;;  %v684_v4 = vpop.f32.mrb[11].mxu0  ;;  %2774 = vmatprep.subr.bf16.mxu1 %v2998_v56  ;;  %v725_v7 = vpop.f32.mrb[11].mxu1  ;;  %v1059_v53 = vmax.bf16 %v3248_v0, %v1043_v42  ;;  %v1061_v56 = vmax.bf16 %v3248_v0, %v1045_v45  ;;  %v3020_v58 = vld [vmem:[#allocation7 + $0x200] sm:$0xff]   ;;  %v3026_v5 = vld [vmem:[#allocation7 + $0x250] sm:$0xff]   ;;  %v3046_v42 = vld [vmem:[#allocation7 + $0x278] sm:$0xff]  }
 0x172   : > { %v1048_v52 = vadd.bf16 %v996_v28, %v818_v41  ;;  %v1050_v54 = vadd.bf16 %v1010_v31, %v820_v44  ;;  %v3025_v4 = vld [vmem:[#allocation7 + $0x288] sm:$0xff]   ;;  %v3044_v41 = vld [vmem:[#allocation7 + $0x230] sm:$0xff]   ;;  %v3047_v44 = vld [vmem:[#allocation7 + $0x2f8] sm:$0xff]  }
 0x173   : > { %v3045_v28 = vld [vmem:[#allocation7 + $0x2b0] sm:$0xff]  }
 0x174   : > { %2753 = vmatpush3.bf16.msra.mxu0 %v2999_v61  ;;  %2775 = vmatpush3.bf16.msra.mxu1 %v3000_v2  ;;  %v3022_v61 = vld [vmem:[#allocation7 + $0x248] sm:$0xff]   ;;  %v1064_v63 = vmax.bf16 %v3248_v0, %v1048_v52  ;;  %v1066_v1 = vmax.bf16 %v3248_v0, %v1050_v54  ;;  %v878_v2 = vcombine.high %v3527_v37, %v3527_v37  ;;  %v3030_v37 = vld [vmem:[#allocation7 + $0x258] sm:$0xff]   ;;  %v3050_v52 = vld [vmem:[#allocation7 + $0x340] sm:$0xff]  }
 0x175   : > { %2754 = vmatprep.subr.bf16.mxu0 %v3001_v3  ;;  %2776 = vmatprep.subr.bf16.mxu1 %v3002_v6  ;;  %v3024_v3 = vld [vmem:[#allocation7 + $0x208] sm:$0xff]   ;;  %v3027_v6 = vld [vmem:[#allocation7 + $0x2d0] sm:$0xff]  }
 0x176   : > { %v3548_v13 = vpop.f32.mrb[12].mxu0  ;;  %v3552_v17 = vpop.f32.mrb[12].mxu1  ;;  %v3575_v7 = vrot.slane %v878_v2, %v3500_v43  ;;  %v3056_v2 = vld [vmem:[#allocation7 + $0x308] sm:$0xff]  }
 0x177   : > { %v3550_v16 = vpop.f32.mrb[13].mxu0  ;;  %v3554_v21 = vpop.f32.mrb[13].mxu1 }
 0x178   : > { %2755 = vmatpush3.bf16.msra.mxu0 %v3003_v9  ;;  %v765_v20 = vpop.f32.mrb[14].mxu0  ;;  %2777 = vmatpush3.bf16.msra.mxu1 %v3004_v50  ;;  %v806_v25 = vpop.f32.mrb[14].mxu1  ;;  %v3029_v9 = vld [vmem:[#allocation7 + $0x290] sm:$0xff]   ;;  %v894_v50 = vcombine.high %v3575_v7, %v3575_v7  ;;  %v822_v31 = vpack.c.bf16 %v3550_v16, %v3550_v16 }
 0x179   : > { %2756 = vmatprep.subr.bf16.mxu0 %v3005_v11  ;;  %v766_v24 = vpop.f32.mrb[15].mxu0  ;;  %2778 = vmatprep.subr.bf16.mxu1 %v3006_v12  ;;  %v807_v29 = vpop.f32.mrb[15].mxu1  ;;  %v3032_v11 = vld [vmem:[#allocation7 + $0x218] sm:$0xff]   ;;  %v901_v12 = vrot.slane %v3531_v48, %v3500_v43  ;;  %v3036_v20 = vld [vmem:[#allocation7 + $0x220] sm:$0xff]   ;;  %v3039_v25 = vld [vmem:[#allocation7 + $0x2e8] sm:$0xff]  }
 0x17a   : > { %v922_v19 = vrot.slane %v894_v50, %v3500_v43  ;;  %v3038_v24 = vld [vmem:[#allocation7 + $0x268] sm:$0xff]   ;;  %v908_v50 = vrot.slane %v3575_v7, %v3500_v43 }
 0x17b   : > { %v3040_v48 = vld [vmem:[#allocation7 + $0x228] sm:$0xff]  }
 0x17c   : > { %2757 = vmatpush3.bf16.msra.mxu0 %v3008_v18  ;;  %2779 = vmatpush3.bf16.msra.mxu1 %v3009_v22  ;;  %v3035_v18 = vld [vmem:[#allocation7 + $0x2e0] sm:$0xff]   ;;  %v923_v22 = vcombine.high %v901_v12, %v901_v12  ;;  %v926_v27 = vcombine.high %v922_v19, %v922_v19  ;;  %v1019_v34 = vpack.i.b16 %v922_v19, %v922_v19  ;;  %v3074_v7 = vld [vmem:[#allocation7 + $0x3a8] sm:$0xff]  }
 0x17d   : > { %2758 = vmatprep.subr.bf16.mxu0 %v3010_v23  ;;  %2780 = vmatprep.subr.bf16.mxu1 %v3011_v26  ;;  %v3037_v23 = vld [vmem:[#allocation7 + $0x2a0] sm:$0xff]   ;;  %v984_v26 = vpack.i.b16 %v901_v12, %v901_v12  ;;  %v1012_v43 = vpack.i.b16 %v908_v50, %v908_v50 }
 0x17e   : > { %v998_v29 = vpack.i.b16 %v923_v22, %v923_v22  ;;  %v1024_v57 = vrot.slane %v1019_v34, %v3510_v55  ;;  %v3066_v12 = vld [vmem:[#allocation7 + $0x360] sm:$0xff]   ;;  %v3072_v22 = vld [vmem:[#allocation7 + $0x3e8] sm:$0xff]   ;;  %v3079_v34 = vld [vmem:[#allocation7 + $0x378] sm:$0xff]  }
 0x17f   : > { %v3069_v19 = vld [vmem:[#allocation7 + $0x3a0] sm:$0xff]  }
 0x180   : > { %2759 = vmatpush3.bf16.msra.mxu0 %v3012_v36  ;;  %2781 = vmatpush3.bf16.msra.mxu1 %v3013_v38  ;;  %v989_v36 = vrot.slane %v984_v26, %v3510_v55  ;;  %v1033_v38 = vpack.i.b16 %v926_v27, %v926_v27  ;;  %v1052_v54 = vadd.bf16 %v1024_v57, %v822_v31  ;;  %v3076_v26 = vld [vmem:[#allocation7 + $0x3f0] sm:$0xff]  }
 0x181   : > { %2760 = vmatprep.subr.bf16.mxu0 %v3014_v39  ;;  %2782 = vmatprep.subr.bf16.mxu1 %v3015_v40  ;;  %v819_v39 = vpack.c.bf16 %v3541_v60, %v3541_v60  ;;  %v1003_v40 = vrot.slane %v998_v29, %v3510_v55  ;;  %v823_v27 = vpack.c.bf16 %v3552_v17, %v3552_v17  ;;  %v3077_v29 = vld [vmem:[#allocation7 + $0x330] sm:$0xff]   ;;  %v3082_v17 = vld [vmem:[#allocation7 + $0x3b8] sm:$0xff]  }
 0x182   : > { %v1047_v45 = vadd.bf16 %v989_v36, %v817_v35  ;;  %v1038_v60 = vrot.slane %v1033_v38, %v3510_v55  ;;  %v3080_v35 = vld [vmem:[#allocation7 + $0x3f8] sm:$0xff]  }
 0x183   : > { %v3081_v38 = vld [vmem:[#allocation7 + $0x338] sm:$0xff]  }
 0x184   : > { %2761 = vmatpush3.bf16.msra.mxu0 %v3016_v46  ;;  %2783 = vmatpush3.bf16.msra.mxu1 %v3017_v47  ;;  %v824_v46 = vpack.c.bf16 %v3554_v21, %v3554_v21  ;;  %v1049_v47 = vadd.bf16 %v1003_v40, %v819_v39  ;;  %v1063_v16 = vmax.bf16 %v3248_v0, %v1047_v45  ;;  %v3053_v21 = vld [vmem:[#allocation7 + $0x380] sm:$0xff]  }
 0x185   : > { %2790 = vmatprep.subr.bf16.mxu0 %v3018_v49  ;;  %2812 = vmatprep.subr.bf16.mxu1 %v3019_v51  ;;  %v3048_v49 = vld [vmem:[#allocation7 + $0x238] sm:$0xff]  }
 0x186   : > { %v3049_v51 = vld [vmem:[#allocation7 + $0x2b8] sm:$0xff]  }
 0x187   : > { %2215 = vmatmul.mubr.bf16.vlgmr.msra.gmra.mrb[20].mxu0 %v1059_v53  ;;  %2255 = vmatmul.mubr.bf16.vlgmr.msra.gmra.mrb[20].mxu1 %v1061_v56  ;;  %v3051_v53 = vld [vmem:[#allocation7 + $0x3c0] sm:$0xff]   ;;  %v1054_v56 = vadd.bf16 %v1038_v60, %v824_v46 }
 0x188   : > { %2791 = vmatpush3.bf16.msra.mxu0 %v3020_v58  ;;  %2813 = vmatpush3.bf16.msra.mxu1 %v3021_v59  ;;  %v1065_v58 = vmax.bf16 %v3248_v0, %v1049_v47  ;;  %v3052_v59 = vld [vmem:[#allocation7 + $0x300] sm:$0xff]  }
 0x189   : > { %2792 = vmatprep.subr.bf16.mxu0 %v3022_v61  ;;  %2814 = vmatprep.subr.bf16.mxu1 %v3023_v62  ;;  %v3054_v61 = vld [vmem:[#allocation7 + $0x348] sm:$0xff]  }
 0x18a   : > { %2294 = vmatprep.mubr.bf16.mxu0 %v1064_v63  ;;  %2334 = vmatprep.mubr.bf16.mxu1 %v1066_v1  ;;  %v3055_v62 = vld [vmem:[#allocation7 + $0x3c8] sm:$0xff]   ;;  %v1068_v63 = vmax.bf16 %v3248_v0, %v1052_v54  ;;  %v1070_v1 = vmax.bf16 %v3248_v0, %v1054_v56 }
 0x18c   : > { %2793 = vmatpush3.bf16.msra.mxu0 %v3024_v3  ;;  %2815 = vmatpush3.bf16.msra.mxu1 %v3025_v4  ;;  %v3057_v3 = vld [vmem:[#allocation7 + $0x388] sm:$0xff]   ;;  %v3058_v4 = vld [vmem:[#allocation7 + $0x350] sm:$0xff]  }
 0x18d   : > { %2794 = vmatprep.subr.bf16.mxu0 %v3026_v5  ;;  %2816 = vmatprep.subr.bf16.mxu1 %v3027_v6  ;;  %v3059_v5 = vld [vmem:[#allocation7 + $0x3d0] sm:$0xff]  }
 0x18e   : > { %v3060_v6 = vld [vmem:[#allocation7 + $0x310] sm:$0xff]  }
 0x190   : > { %2795 = vmatpush3.bf16.msra.mxu0 %v3028_v8  ;;  %2817 = vmatpush3.bf16.msra.mxu1 %v3029_v9  ;;  %v3061_v8 = vld [vmem:[#allocation7 + $0x390] sm:$0xff]   ;;  %v3062_v9 = vld [vmem:[#allocation7 + $0x358] sm:$0xff]  }
 0x191   : > { %2796 = vmatprep.subr.bf16.mxu0 %v3030_v37  ;;  %2818 = vmatprep.subr.bf16.mxu1 %v3031_v10  ;;  %v3063_v37 = vld [vmem:[#allocation7 + $0x3d8] sm:$0xff]  }
 0x192   : > { %v3064_v10 = vld [vmem:[#allocation7 + $0x318] sm:$0xff]  }
 0x194   : > { %2797 = vmatpush3.bf16.msra.mxu0 %v3032_v11  ;;  %2819 = vmatpush3.bf16.msra.mxu1 %v3033_v14  ;;  %v3065_v11 = vld [vmem:[#allocation7 + $0x398] sm:$0xff]   ;;  %v3067_v14 = vld [vmem:[#allocation7 + $0x3e0] sm:$0xff]  }
 0x195   : > { %2798 = vmatprep.subr.bf16.mxu0 %v3034_v15  ;;  %2820 = vmatprep.subr.bf16.mxu1 %v3035_v18  ;;  %v3068_v15 = vld [vmem:[#allocation7 + $0x320] sm:$0xff]   ;;  %v924_v18 = vcombine.high %v908_v50, %v908_v50 }
 0x198   : > { %2799 = vmatpush3.bf16.msra.mxu0 %v3036_v20  ;;  %2821 = vmatpush3.bf16.msra.mxu1 %v3037_v23  ;;  %v3071_v20 = vld [vmem:[#allocation7 + $0x368] sm:$0xff]  }
 0x199   : > { %2800 = vmatprep.subr.bf16.mxu0 %v3038_v24  ;;  %2822 = vmatprep.subr.bf16.mxu1 %v3039_v25  ;;  %v3073_v23 = vld [vmem:[#allocation7 + $0x328] sm:$0xff]   ;;  %v1026_v24 = vpack.i.b16 %v924_v18, %v924_v18  ;;  %v3075_v25 = vld [vmem:[#allocation7 + $0x370] sm:$0xff]  }
 0x19c   : > { %2801 = vmatpush3.bf16.msra.mxu0 %v3040_v48  ;;  %2823 = vmatpush3.bf16.msra.mxu1 %v3041_v30  ;;  %v1031_v48 = vrot.slane %v1026_v24, %v3510_v55  ;;  %v821_v30 = vpack.c.bf16 %v3548_v13, %v3548_v13 }
 0x19d   : > { %2802 = vmatprep.subr.bf16.mxu0 %v3042_v32  ;;  %2824 = vmatprep.subr.bf16.mxu1 %v3043_v33  ;;  %v1017_v32 = vrot.slane %v1012_v43, %v3510_v55  ;;  %v3078_v33 = vld [vmem:[#allocation7 + $0x3b0] sm:$0xff]  }
 0x19e   : > { %v1053_v36 = vadd.bf16 %v1031_v48, %v823_v27 }
 0x19f   : > { %v1051_v39 = vadd.bf16 %v1017_v32, %v821_v30 }
 0x1a0   : > { %2803 = vmatpush3.bf16.msra.mxu0 %v3044_v41  ;;  %2825 = vmatpush3.bf16.msra.mxu1 %v3045_v28  ;;  %v1069_v40 = vmax.bf16 %v3248_v0, %v1053_v36  ;;  %v2571_v28 = vld [vmem:[%s3633_s4] ss:$0 sm:$0xff] }
 0x1a1   : > { %2804 = vmatprep.subr.bf16.mxu0 %v3046_v42  ;;  %2826 = vmatprep.subr.bf16.mxu1 %v3047_v44  ;;  %v1067_v13 = vmax.bf16 %v3248_v0, %v1051_v39 }
 0x1a4   : > { %2805 = vmatpush3.bf16.msra.mxu0 %v3048_v49  ;;  %2827 = vmatpush3.bf16.msra.mxu1 %v3049_v51 }
 0x1a5   : > { %2834 = vmatprep.subr.bf16.mxu0 %v3050_v52  ;;  %2856 = vmatprep.subr.bf16.mxu1 %v3051_v53 }
 0x1a7   : > { %2295 = vmatmul.mubr.bf16.vlgmr.msra.gmra.mrb[24].mxu0 %v1063_v16  ;;  %2335 = vmatmul.mubr.bf16.vlgmr.msra.gmra.mrb[24].mxu1 %v1065_v58 }
 0x1a8   : > { %2835 = vmatpush3.bf16.msra.mxu0 %v3052_v59  ;;  %2857 = vmatpush3.bf16.msra.mxu1 %v3053_v21 }
 0x1a9   : > { %2836 = vmatprep.subr.bf16.mxu0 %v3054_v61  ;;  %2858 = vmatprep.subr.bf16.mxu1 %v3055_v62 }
 0x1aa   : > { %2374 = vmatprep.mubr.bf16.mxu0 %v1068_v63  ;;  %2414 = vmatprep.mubr.bf16.mxu1 %v1070_v1 }
 0x1ac   : > { %2837 = vmatpush3.bf16.msra.mxu0 %v3056_v2  ;;  %2859 = vmatpush3.bf16.msra.mxu1 %v3057_v3 }
 0x1ad   : > { %2838 = vmatprep.subr.bf16.mxu0 %v3058_v4  ;;  %2860 = vmatprep.subr.bf16.mxu1 %v3059_v5 }
 0x1b0   : > { %2839 = vmatpush3.bf16.msra.mxu0 %v3060_v6  ;;  %2861 = vmatpush3.bf16.msra.mxu1 %v3061_v8 }
 0x1b1   : > { %2840 = vmatprep.subr.bf16.mxu0 %v3062_v9  ;;  %2862 = vmatprep.subr.bf16.mxu1 %v3063_v37 }
 0x1b4   : > { %2841 = vmatpush3.bf16.msra.mxu0 %v3064_v10  ;;  %2863 = vmatpush3.bf16.msra.mxu1 %v3065_v11 }
 0x1b5   : > { %2842 = vmatprep.subr.bf16.mxu0 %v3066_v12  ;;  %2864 = vmatprep.subr.bf16.mxu1 %v3067_v14 }
 0x1b8   : > { %2843 = vmatpush3.bf16.msra.mxu0 %v3068_v15  ;;  %2865 = vmatpush3.bf16.msra.mxu1 %v3069_v19 }
 0x1b9   : > { %2844 = vmatprep.subr.bf16.mxu0 %v3071_v20  ;;  %2866 = vmatprep.subr.bf16.mxu1 %v3072_v22 }
 0x1bc   : > { %2845 = vmatpush3.bf16.msra.mxu0 %v3073_v23  ;;  %2867 = vmatpush3.bf16.msra.mxu1 %v3074_v7 }
 0x1bd   : > { %2846 = vmatprep.subr.bf16.mxu0 %v3075_v25  ;;  %2868 = vmatprep.subr.bf16.mxu1 %v3076_v26 }
 0x1c0   : > { %2847 = vmatpush3.bf16.msra.mxu0 %v3077_v29  ;;  %2869 = vmatpush3.bf16.msra.mxu1 %v3078_v33 }
 0x1c1   : > { %2848 = vmatprep.subr.bf16.mxu0 %v3079_v34  ;;  %2870 = vmatprep.subr.bf16.mxu1 %v3080_v35 }
 0x1c4   : > { %2849 = vmatpush3.bf16.msra.mxu0 %v3081_v38  ;;  %2871 = vmatpush3.bf16.msra.mxu1 %v3082_v17 }
 0x1c7   : > { %2375 = vmatmul.mubr.bf16.vlgmr.msra.gmra.mrb[28].mxu0 %v1067_v13  ;;  %2415 = vmatmul.mubr.bf16.vlgmr.msra.gmra.mrb[28].mxu1 %v1069_v40 }
 0x23a   : > { %v2718_v55 = vpop.f32.mrb[16].mxu0  ;;  %v2740_v41 = vpop.f32.mrb[16].mxu1 }
 0x23b   : > { %v2719_v42 = vpop.f32.mrb[17].mxu0  ;;  %v2741_v31 = vpop.f32.mrb[17].mxu1 }
 0x23c   : > { %v2720_v44 = vadd.f32 %v2719_v42, %v2718_v55  ;;  %v2721_v57 = vpop.f32.mrb[18].mxu0  ;;  %v2742_v45 = vadd.f32 %v2741_v31, %v2740_v41  ;;  %v2743_v46 = vpop.f32.mrb[18].mxu1 }
 0x23d   : > { %v2722_v60 = vpop.f32.mrb[19].mxu0  ;;  %v2744_v49 = vpop.f32.mrb[19].mxu1 }
 0x23e   : > { %v2137_v47 = vadd.f32 %v2720_v44, %v2571_v28 }
 0x240   : > { %v2177_v51 = vadd.f32 %v2742_v45, %v2137_v47 }
 0x25a   : > { %v2762_v0 = vpop.f32.mrb[20].mxu0  ;;  %v2784_v52 = vpop.f32.mrb[20].mxu1 }
 0x25b   : > { %v2763_v53 = vpop.f32.mrb[21].mxu0  ;;  %v2785_v16 = vpop.f32.mrb[21].mxu1 }
 0x25c   : > { %v2764_v54 = vadd.f32 %v2763_v53, %v2762_v0  ;;  %v2765_v56 = vpop.f32.mrb[22].mxu0  ;;  %v2786_v58 = vadd.f32 %v2785_v16, %v2784_v52  ;;  %v2787_v59 = vpop.f32.mrb[22].mxu1 }
 0x25d   : > { %v2766_v21 = vpop.f32.mrb[23].mxu0  ;;  %v2788_v62 = vpop.f32.mrb[23].mxu1 }
 0x25e   : > { %v2217_v61 = vadd.f32 %v2764_v54, %v2177_v51 }
 0x260   : > { %v2257_v63 = vadd.f32 %v2786_v58, %v2217_v61 }
 0x27a   : > { %v2806_v1 = vpop.f32.mrb[24].mxu0  ;;  %v2828_v2 = vpop.f32.mrb[24].mxu1 }
 0x27b   : > { %v2807_v3 = vpop.f32.mrb[25].mxu0  ;;  %v2829_v5 = vpop.f32.mrb[25].mxu1 }
 0x27c   : > { %v2808_v4 = vadd.f32 %v2807_v3, %v2806_v1  ;;  %v2809_v6 = vpop.f32.mrb[26].mxu0  ;;  %v2830_v8 = vadd.f32 %v2829_v5, %v2828_v2  ;;  %v2831_v9 = vpop.f32.mrb[26].mxu1 }
 0x27d   : > { %v2810_v37 = vpop.f32.mrb[27].mxu0  ;;  %v2832_v50 = vpop.f32.mrb[27].mxu1 }
 0x27e   : > { %v2297_v10 = vadd.f32 %v2808_v4, %v2257_v63 }
 0x280   : > { %v2337_v11 = vadd.f32 %v2830_v8, %v2297_v10 }
 0x29a   : > { %v2850_v12 = vpop.f32.mrb[28].mxu0  ;;  %v2872_v14 = vpop.f32.mrb[28].mxu1 }
 0x29b   : > { %v2851_v15 = vpop.f32.mrb[29].mxu0  ;;  %v2873_v19 = vpop.f32.mrb[29].mxu1 }
 0x29c   : > { %v2852_v18 = vadd.f32 %v2851_v15, %v2850_v12  ;;  %v2853_v20 = vpop.f32.mrb[30].mxu0  ;;  %v2874_v22 = vadd.f32 %v2873_v19, %v2872_v14  ;;  %v2875_v23 = vpop.f32.mrb[30].mxu1 }
 0x29d   : > { %v2854_v24 = vpop.f32.mrb[31].mxu0  ;;  %v2876_v7 = vpop.f32.mrb[31].mxu1 }
 0x29e   : > { %v2377_v43 = vadd.f32 %v2852_v18, %v2337_v11 }
 0x2a0   : > { %v2417_v25 = vadd.f32 %v2874_v22, %v2377_v43 }
 0x2a2   : > { %2422 = vst [vmem:[%s281_s21] sm:$0xff] %v2417_v25 }
 0x2a3 PF: > { %p17_p9 = scmp.ge.s32.totalorder %s3404_s12, 4   ;;  %s3649_s18 = smov %s3231_s19 }
 0x2a4   : > { %s3650_s19 = smov %s3235_s20  ;;  %s3651_s20 = smov %s3413_s26 }
 0x2a5   : > { %s3652_s21 = smov %s3404_s12  ;;  %19 = sbr.rel (!%p17_p9) target bundleno = 5 (0x5), region = 92 }
 0x2ac   :  { %2442 = vsyncpa [#allocation3], 1 }
 0x2ad   :  { %2444 = vsyncpa [#allocation3 + $0x1], 1 }
 0x2ae   :  { %2445 = vsyncpa [#allocation5], 1 }
 0x2af   :  { %2446 = vsyncpa [#allocation8], 1 }

</bundles_post_ra>
